<compile_context>
chip_gen: v7x
topology: tpu7x:2x2x1
jax: 0.10.0
libtpu: 0.0.40
codegen_flags: <defaults>
</compile_context>

<pallas_src>
import functools

import jax
import jax.numpy as jnp
from jax.experimental import pallas as pl
from jax.experimental.pallas import tpu as pltpu


def _sym_focal_tversky_kernel(p_ref, t_ref, out_ref,
                              acc_tp, acc_tp0, acc_t, acc_t0, acc_p, acc_p0,
                              *, delta, gamma, eps):
    k = pl.program_id(1)

    @pl.when(k == 0)
    def _init():
        acc_tp[...] = jnp.zeros_like(acc_tp)
        acc_tp0[...] = jnp.zeros_like(acc_tp0)
        acc_t[...] = jnp.zeros_like(acc_t)
        acc_t0[...] = jnp.zeros_like(acc_t0)
        acc_p[...] = jnp.zeros_like(acc_p)
        acc_p0[...] = jnp.zeros_like(acc_p0)

    # (TB, T) lane-dense block; class channel interleaved along lanes.
    p = jnp.clip(p_ref[...].astype(jnp.float32), eps, 1.0 - eps)
    t = t_ref[...].astype(jnp.float32)

    # Even flattened positions -> class 0, odd -> class 1 (block start is a
    # multiple of 128, so block-local parity == global parity).
    lane = jax.lax.broadcasted_iota(jnp.int32, p.shape, dimension=1)
    m0 = (lane % 2 == 0).astype(jnp.float32)

    tp = t * p
    acc_tp[...] += jnp.sum(tp, axis=-1, keepdims=True)
    acc_tp0[...] += jnp.sum(tp * m0, axis=-1, keepdims=True)
    acc_t[...] += jnp.sum(t, axis=-1, keepdims=True)
    acc_t0[...] += jnp.sum(t * m0, axis=-1, keepdims=True)
    acc_p[...] += jnp.sum(p, axis=-1, keepdims=True)
    acc_p0[...] += jnp.sum(p * m0, axis=-1, keepdims=True)

    @pl.when(k == pl.num_programs(1) - 1)
    def _finalize():
        tp0 = acc_tp0[...]
        tp1 = acc_tp[...] - tp0
        st0 = acc_t0[...]
        st1 = acc_t[...] - st0
        sp0 = acc_p0[...]
        sp1 = acc_p[...] - sp0
        # fn = sum(t) - tp, fp = sum(p) - tp
        fn0 = st0 - tp0
        fp0 = sp0 - tp0
        fn1 = st1 - tp1
        fp1 = sp1 - tp1
        d0 = (tp0 + eps) / (tp0 + delta * fn0 + (1.0 - delta) * fp0 + eps)
        d1 = (tp1 + eps) / (tp1 + delta * fn1 + (1.0 - delta) * fp1 + eps)
        om0 = 1.0 - d0
        om1 = 1.0 - d1
        # (1 - d) * (1 - d)^(-gamma); pow written as exp/log (valid for om > 0).
        back = om0 * jnp.exp(-gamma * jnp.log(om0))
        fore = om1 * jnp.exp(-gamma * jnp.log(om1))
        out_ref[:, 0:1] = back
        out_ref[:, 1:2] = fore


def symmetric_focal_tversky_loss(y_pred, y_true, *, delta=0.7, gamma=0.75,
                                 epsilon=1e-7, max_lane_tile=4096):
    """y_pred, y_true: [N, H, W, 2] (class channel last), probabilities / one-hot."""
    N, H, W, C = y_pred.shape
    assert C == 2, "binary segmentation: class channel must be 2"
    HW2 = H * W * C

    # Free contiguous reshape — classes stay interleaved along the last axis.
    p2 = y_pred.reshape(N, HW2)
    t2 = y_true.reshape(N, HW2)

    # Batch tile: full sublane (8) when it divides N, otherwise the whole batch.
    tb = 8 if (N >= 8 and N % 8 == 0) else N

    # Lane tile: largest multiple of 128 dividing H*W*2, capped so the
    # double-buffered working set stays far below VMEM on all generations.
    if HW2 % 128 == 0:
        t = min(HW2, max_lane_tile)
        while HW2 % t != 0:
            t -= 128
    else:
        t = HW2  # full-extent block is always legal

    kernel = functools.partial(_sym_focal_tversky_kernel,
                               delta=float(delta), gamma=float(gamma),
                               eps=float(epsilon))

    grid = (N // tb, HW2 // t)
    per_batch = pl.pallas_call(
        kernel,
        out_shape=jax.ShapeDtypeStruct((N, 2), jnp.float32),
        grid_spec=pltpu.PrefetchScalarGridSpec(
            num_scalar_prefetch=0,
            grid=grid,
            in_specs=[pl.BlockSpec((tb, t), lambda b, k: (b, k)),
                      pl.BlockSpec((tb, t), lambda b, k: (b, k))],
            out_specs=pl.BlockSpec((tb, 2), lambda b, k: (b, 0)),
            scratch_shapes=[pltpu.VMEM((tb, 1), jnp.float32)] * 6,
        ),
        compiler_params=pltpu.CompilerParams(
            dimension_semantics=("parallel", "arbitrary")),
    )(p2, t2)

    # torch.mean(torch.stack([back_dice, fore_dice], -1)) == mean over (N, 2).
    return jnp.mean(per_batch)


def _reference_loss(y_pred, y_true, delta=0.7, gamma=0.75, eps=1e-7):
    """Pure-JAX mirror of the PyTorch SymmetricFocalTverskyLoss.forward."""
    yp = jnp.clip(y_pred, eps, 1.0 - eps)
    tp = jnp.sum(y_true * yp, axis=(1, 2))
    fn = jnp.sum(y_true * (1 - yp), axis=(1, 2))
    fp = jnp.sum((1 - y_true) * yp, axis=(1, 2))
    dice = (tp + eps) / (tp + delta * fn + (1 - delta) * fp + eps)
    back = (1 - dice[:, 0]) * (1 - dice[:, 0]) ** (-gamma)
    fore = (1 - dice[:, 1]) * (1 - dice[:, 1]) ** (-gamma)
    return jnp.mean(jnp.stack([back, fore], axis=-1))


if __name__ == "__main__":
    key = jax.random.PRNGKey(0)
    k1, k2 = jax.random.split(key)

    N, H, W, C = 2, 16, 16, 2
    logits = jax.random.normal(k1, (N, H, W, C), dtype=jnp.float32)
    y_pred = jax.nn.softmax(logits, axis=-1)                  # probabilities
    labels = jax.random.bernoulli(k2, 0.3, (N, H, W)).astype(jnp.int32)
    y_true = jax.nn.one_hot(labels, C, dtype=jnp.float32)     # one-hot, C last

    loss = symmetric_focal_tversky_loss(y_pred, y_true,
                                        delta=0.7, gamma=0.75, epsilon=1e-7)
    loss = jax.block_until_ready(loss)

    ref = _reference_loss(y_pred, y_true)
    assert jnp.allclose(loss, ref, rtol=1e-5, atol=1e-6), (loss, ref)

    print("KERNEL_OK")
</pallas_src>

<mosaic_0001>
module attributes {stable_mosaic.version = 11 : i64} {
  func.func @_sym_focal_tversky_kernel(%arg0: i32, %arg1: i32, %arg2: memref<2x512xf32, #tpu.memory_space<vmem>>, %arg3: memref<2x512xf32, #tpu.memory_space<vmem>>, %arg4: memref<2x2xf32, #tpu.memory_space<vmem>>, %arg5: memref<2x1xf32, #tpu.memory_space<vmem>>, %arg6: memref<2x1xf32, #tpu.memory_space<vmem>>, %arg7: memref<2x1xf32, #tpu.memory_space<vmem>>, %arg8: memref<2x1xf32, #tpu.memory_space<vmem>>, %arg9: memref<2x1xf32, #tpu.memory_space<vmem>>, %arg10: memref<2x1xf32, #tpu.memory_space<vmem>>) attributes {dimension_semantics = [#tpu.dimension_semantics<parallel>, #tpu.dimension_semantics<arbitrary>], iteration_bounds = array<i64: 1, 1>, scalar_prefetch = 0 : i64, scratch_operands = 6 : i64, tpu.core_type = #tpu.core_type<tc>, window_params = [{transform_indices = @transform_0, window_bounds = array<i64: 2, 512>}, {transform_indices = @transform_1, window_bounds = array<i64: 2, 512>}, {transform_indices = @transform_2, window_bounds = array<i64: 2, 2>}]} {
    %c0_i32 = arith.constant 0 : i32
    %0 = arith.cmpi eq, %arg1, %c0_i32 : i32
    %1 = arith.extui %0 : i1 to i32
    %c0_i32_0 = arith.constant 0 : i32
    %2 = arith.cmpi ne, %1, %c0_i32_0 : i32
    scf.if %2 {
      %cst_42 = arith.constant 0.000000e+00 : f32
      %67 = vector.broadcast %cst_42 : f32 to vector<2x1xf32>
      %c0_43 = arith.constant 0 : index
      %c0_44 = arith.constant 0 : index
      %68 = vector.load %arg5[%c0_43, %c0_44] : memref<2x1xf32, #tpu.memory_space<vmem>>, vector<2x1xf32>
      tpu.vector_store %arg5[%c0_43, %c0_44], %67 {strides = array<i32>} : memref<2x1xf32, #tpu.memory_space<vmem>>, vector<2x1xf32>,
      %cst_45 = arith.constant 0.000000e+00 : f32
      %69 = vector.broadcast %cst_45 : f32 to vector<2x1xf32>
      %c0_46 = arith.constant 0 : index
      %c0_47 = arith.constant 0 : index
      %70 = vector.load %arg6[%c0_46, %c0_47] : memref<2x1xf32, #tpu.memory_space<vmem>>, vector<2x1xf32>
      tpu.vector_store %arg6[%c0_46, %c0_47], %69 {strides = array<i32>} : memref<2x1xf32, #tpu.memory_space<vmem>>, vector<2x1xf32>,
      %cst_48 = arith.constant 0.000000e+00 : f32
      %71 = vector.broadcast %cst_48 : f32 to vector<2x1xf32>
      %c0_49 = arith.constant 0 : index
      %c0_50 = arith.constant 0 : index
      %72 = vector.load %arg7[%c0_49, %c0_50] : memref<2x1xf32, #tpu.memory_space<vmem>>, vector<2x1xf32>
      tpu.vector_store %arg7[%c0_49, %c0_50], %71 {strides = array<i32>} : memref<2x1xf32, #tpu.memory_space<vmem>>, vector<2x1xf32>,
      %cst_51 = arith.constant 0.000000e+00 : f32
      %73 = vector.broadcast %cst_51 : f32 to vector<2x1xf32>
      %c0_52 = arith.constant 0 : index
      %c0_53 = arith.constant 0 : index
      %74 = vector.load %arg8[%c0_52, %c0_53] : memref<2x1xf32, #tpu.memory_space<vmem>>, vector<2x1xf32>
      tpu.vector_store %arg8[%c0_52, %c0_53], %73 {strides = array<i32>} : memref<2x1xf32, #tpu.memory_space<vmem>>, vector<2x1xf32>,
      %cst_54 = arith.constant 0.000000e+00 : f32
      %75 = vector.broadcast %cst_54 : f32 to vector<2x1xf32>
      %c0_55 = arith.constant 0 : index
      %c0_56 = arith.constant 0 : index
      %76 = vector.load %arg9[%c0_55, %c0_56] : memref<2x1xf32, #tpu.memory_space<vmem>>, vector<2x1xf32>
      tpu.vector_store %arg9[%c0_55, %c0_56], %75 {strides = array<i32>} : memref<2x1xf32, #tpu.memory_space<vmem>>, vector<2x1xf32>,
      %cst_57 = arith.constant 0.000000e+00 : f32
      %77 = vector.broadcast %cst_57 : f32 to vector<2x1xf32>
      %c0_58 = arith.constant 0 : index
      %c0_59 = arith.constant 0 : index
      %78 = vector.load %arg10[%c0_58, %c0_59] : memref<2x1xf32, #tpu.memory_space<vmem>>, vector<2x1xf32>
      tpu.vector_store %arg10[%c0_58, %c0_59], %77 {strides = array<i32>} : memref<2x1xf32, #tpu.memory_space<vmem>>, vector<2x1xf32>,
    } else {
    }
    %c0 = arith.constant 0 : index
    %c0_1 = arith.constant 0 : index
    %3 = vector.load %arg2[%c0, %c0_1] : memref<2x512xf32, #tpu.memory_space<vmem>>, vector<2x512xf32>
    %cst = arith.constant 1.000000e-07 : f32
    %cst_2 = arith.constant 0.99999988 : f32
    %4 = vector.broadcast %cst : f32 to vector<2x512xf32>
    %5 = arith.maximumf %4, %3 : vector<2x512xf32>
    %6 = vector.broadcast %cst_2 : f32 to vector<2x512xf32>
    %7 = arith.minimumf %6, %5 : vector<2x512xf32>
    %c0_3 = arith.constant 0 : index
    %c0_4 = arith.constant 0 : index
    %8 = vector.load %arg3[%c0_3, %c0_4] : memref<2x512xf32, #tpu.memory_space<vmem>>, vector<2x512xf32>
    %9 = tpu.iota {dimensions = array<i32: 1>} : vector<2x512xi32>
    %c2_i32 = arith.constant 2 : i32
    %c0_i32_5 = arith.constant 0 : i32
    %10 = arith.cmpi eq, %c2_i32, %c0_i32_5 : i32
    %c1_i32 = arith.constant 1 : i32
    %11 = arith.select %10, %c1_i32, %c2_i32 : i32
    %12 = vector.broadcast %11 : i32 to vector<2x512xi32>
    %13 = arith.remsi %9, %12 : vector<2x512xi32>
    %c0_i32_6 = arith.constant 0 : i32
    %14 = vector.broadcast %c0_i32_6 : i32 to vector<2x512xi32>
    %15 = arith.cmpi ne, %13, %14 : vector<2x512xi32>
    %c0_i32_7 = arith.constant 0 : i32
    %16 = vector.broadcast %c0_i32_7 : i32 to vector<2x512xi32>
    %17 = arith.cmpi slt, %13, %16 : vector<2x512xi32>
    %c0_i32_8 = arith.constant 0 : i32
    %18 = arith.cmpi slt, %11, %c0_i32_8 : i32
    %19 = vector.broadcast %18 : i1 to vector<2x512xi1>
    %20 = vector.broadcast %19 : vector<2x512xi1> to vector<2x512xi1>
    %21 = arith.xori %17, %20 : vector<2x512xi1>
    %22 = arith.andi %21, %15 : vector<2x512xi1>
    %23 = vector.broadcast %11 : i32 to vector<2x512xi32>
    %24 = arith.addi %13, %23 : vector<2x512xi32>
    %25 = arith.select %22, %24, %13 : vector<2x512xi1>, vector<2x512xi32>
    %c0_i32_9 = arith.constant 0 : i32
    %26 = vector.broadcast %c0_i32_9 : i32 to vector<2x512xi32>
    %27 = arith.cmpi eq, %25, %26 : vector<2x512xi32>
    %28 = arith.extui %27 : vector<2x512xi1> to vector<2x512xi32>
    %29 = arith.sitofp %28 : vector<2x512xi32> to vector<2x512xf32>
    %30 = arith.mulf %8, %7 : vector<2x512xf32>
    %c0_10 = arith.constant 0 : index
    %c0_11 = arith.constant 0 : index
    %31 = vector.load %arg5[%c0_10, %c0_11] : memref<2x1xf32, #tpu.memory_space<vmem>>, vector<2x1xf32>
    %cst_12 = arith.constant dense<0.000000e+00> : vector<2xf32>
    %32 = vector.multi_reduction <add>, %30, %cst_12 [1] : vector<2x512xf32> to vector<2xf32>
    %33 = vector.shape_cast %32 : vector<2xf32> to vector<2x1xf32>
    %34 = arith.addf %31, %33 : vector<2x1xf32>
    %c0_13 = arith.constant 0 : index
    %c0_14 = arith.constant 0 : index
    %35 = vector.load %arg5[%c0_13, %c0_14] : memref<2x1xf32, #tpu.memory_space<vmem>>, vector<2x1xf32>
    tpu.vector_store %arg5[%c0_13, %c0_14], %34 {strides = array<i32>} : memref<2x1xf32, #tpu.memory_space<vmem>>, vector<2x1xf32>,
    %c0_15 = arith.constant 0 : index
    %c0_16 = arith.constant 0 : index
    %36 = vector.load %arg6[%c0_15, %c0_16] : memref<2x1xf32, #tpu.memory_space<vmem>>, vector<2x1xf32>
    %37 = arith.mulf %30, %29 : vector<2x512xf32>
    %cst_17 = arith.constant dense<0.000000e+00> : vector<2xf32>
    %38 = vector.multi_reduction <add>, %37, %cst_17 [1] : vector<2x512xf32> to vector<2xf32>
    %39 = vector.shape_cast %38 : vector<2xf32> to vector<2x1xf32>
    %40 = arith.addf %36, %39 : vector<2x1xf32>
    %c0_18 = arith.constant 0 : index
    %c0_19 = arith.constant 0 : index
    %41 = vector.load %arg6[%c0_18, %c0_19] : memref<2x1xf32, #tpu.memory_space<vmem>>, vector<2x1xf32>
    tpu.vector_store %arg6[%c0_18, %c0_19], %40 {strides = array<i32>} : memref<2x1xf32, #tpu.memory_space<vmem>>, vector<2x1xf32>,
    %c0_20 = arith.constant 0 : index
    %c0_21 = arith.constant 0 : index
    %42 = vector.load %arg7[%c0_20, %c0_21] : memref<2x1xf32, #tpu.memory_space<vmem>>, vector<2x1xf32>
    %cst_22 = arith.constant dense<0.000000e+00> : vector<2xf32>
    %43 = vector.multi_reduction <add>, %8, %cst_22 [1] : vector<2x512xf32> to vector<2xf32>
    %44 = vector.shape_cast %43 : vector<2xf32> to vector<2x1xf32>
    %45 = arith.addf %42, %44 : vector<2x1xf32>
    %c0_23 = arith.constant 0 : index
    %c0_24 = arith.constant 0 : index
    %46 = vector.load %arg7[%c0_23, %c0_24] : memref<2x1xf32, #tpu.memory_space<vmem>>, vector<2x1xf32>
    tpu.vector_store %arg7[%c0_23, %c0_24], %45 {strides = array<i32>} : memref<2x1xf32, #tpu.memory_space<vmem>>, vector<2x1xf32>,
    %c0_25 = arith.constant 0 : index
    %c0_26 = arith.constant 0 : index
    %47 = vector.load %arg8[%c0_25, %c0_26] : memref<2x1xf32, #tpu.memory_space<vmem>>, vector<2x1xf32>
    %48 = arith.mulf %8, %29 : vector<2x512xf32>
    %cst_27 = arith.constant dense<0.000000e+00> : vector<2xf32>
    %49 = vector.multi_reduction <add>, %48, %cst_27 [1] : vector<2x512xf32> to vector<2xf32>
    %50 = vector.shape_cast %49 : vector<2xf32> to vector<2x1xf32>
    %51 = arith.addf %47, %50 : vector<2x1xf32>
    %c0_28 = arith.constant 0 : index
    %c0_29 = arith.constant 0 : index
    %52 = vector.load %arg8[%c0_28, %c0_29] : memref<2x1xf32, #tpu.memory_space<vmem>>, vector<2x1xf32>
    tpu.vector_store %arg8[%c0_28, %c0_29], %51 {strides = array<i32>} : memref<2x1xf32, #tpu.memory_space<vmem>>, vector<2x1xf32>,
    %c0_30 = arith.constant 0 : index
    %c0_31 = arith.constant 0 : index
    %53 = vector.load %arg9[%c0_30, %c0_31] : memref<2x1xf32, #tpu.memory_space<vmem>>, vector<2x1xf32>
    %cst_32 = arith.constant dense<0.000000e+00> : vector<2xf32>
    %54 = vector.multi_reduction <add>, %7, %cst_32 [1] : vector<2x512xf32> to vector<2xf32>
    %55 = vector.shape_cast %54 : vector<2xf32> to vector<2x1xf32>
    %56 = arith.addf %53, %55 : vector<2x1xf32>
    %c0_33 = arith.constant 0 : index
    %c0_34 = arith.constant 0 : index
    %57 = vector.load %arg9[%c0_33, %c0_34] : memref<2x1xf32, #tpu.memory_space<vmem>>, vector<2x1xf32>
    tpu.vector_store %arg9[%c0_33, %c0_34], %56 {strides = array<i32>} : memref<2x1xf32, #tpu.memory_space<vmem>>, vector<2x1xf32>,
    %c0_35 = arith.constant 0 : index
    %c0_36 = arith.constant 0 : index
    %58 = vector.load %arg10[%c0_35, %c0_36] : memref<2x1xf32, #tpu.memory_space<vmem>>, vector<2x1xf32>
    %59 = arith.mulf %7, %29 : vector<2x512xf32>
    %cst_37 = arith.constant dense<0.000000e+00> : vector<2xf32>
    %60 = vector.multi_reduction <add>, %59, %cst_37 [1] : vector<2x512xf32> to vector<2xf32>
    %61 = vector.shape_cast %60 : vector<2xf32> to vector<2x1xf32>
    %62 = arith.addf %58, %61 : vector<2x1xf32>
    %c0_38 = arith.constant 0 : index
    %c0_39 = arith.constant 0 : index
    %63 = vector.load %arg10[%c0_38, %c0_39] : memref<2x1xf32, #tpu.memory_space<vmem>>, vector<2x1xf32>
    tpu.vector_store %arg10[%c0_38, %c0_39], %62 {strides = array<i32>} : memref<2x1xf32, #tpu.memory_space<vmem>>, vector<2x1xf32>,
    %c0_i32_40 = arith.constant 0 : i32
    %64 = arith.cmpi eq, %arg1, %c0_i32_40 : i32
    %65 = arith.extui %64 : i1 to i32
    %c0_i32_41 = arith.constant 0 : i32
    %66 = arith.cmpi ne, %65, %c0_i32_41 : i32
    scf.if %66 {
      %c0_42 = arith.constant 0 : index
      %c0_43 = arith.constant 0 : index
      %67 = vector.load %arg6[%c0_42, %c0_43] : memref<2x1xf32, #tpu.memory_space<vmem>>, vector<2x1xf32>
      %c0_44 = arith.constant 0 : index
      %c0_45 = arith.constant 0 : index
      %68 = vector.load %arg5[%c0_44, %c0_45] : memref<2x1xf32, #tpu.memory_space<vmem>>, vector<2x1xf32>
      %69 = arith.subf %68, %67 : vector<2x1xf32>
      %c0_46 = arith.constant 0 : index
      %c0_47 = arith.constant 0 : index
      %70 = vector.load %arg8[%c0_46, %c0_47] : memref<2x1xf32, #tpu.memory_space<vmem>>, vector<2x1xf32>
      %c0_48 = arith.constant 0 : index
      %c0_49 = arith.constant 0 : index
      %71 = vector.load %arg7[%c0_48, %c0_49] : memref<2x1xf32, #tpu.memory_space<vmem>>, vector<2x1xf32>
      %72 = arith.subf %71, %70 : vector<2x1xf32>
      %c0_50 = arith.constant 0 : index
      %c0_51 = arith.constant 0 : index
      %73 = vector.load %arg10[%c0_50, %c0_51] : memref<2x1xf32, #tpu.memory_space<vmem>>, vector<2x1xf32>
      %c0_52 = arith.constant 0 : index
      %c0_53 = arith.constant 0 : index
      %74 = vector.load %arg9[%c0_52, %c0_53] : memref<2x1xf32, #tpu.memory_space<vmem>>, vector<2x1xf32>
      %75 = arith.subf %74, %73 : vector<2x1xf32>
      %76 = arith.subf %70, %67 : vector<2x1xf32>
      %77 = arith.subf %73, %67 : vector<2x1xf32>
      %78 = arith.subf %72, %69 : vector<2x1xf32>
      %79 = arith.subf %75, %69 : vector<2x1xf32>
      %cst_54 = arith.constant 1.000000e-07 : f32
      %80 = vector.broadcast %cst_54 : f32 to vector<2x1xf32>
      %81 = arith.addf %67, %80 : vector<2x1xf32>
      %cst_55 = arith.constant 0.699999988 : f32
      %82 = vector.broadcast %cst_55 : f32 to vector<2x1xf32>
      %83 = arith.mulf %82, %76 : vector<2x1xf32>
      %84 = arith.addf %67, %83 : vector<2x1xf32>
      %cst_56 = arith.constant 3.000000e-01 : f32
      %85 = vector.broadcast %cst_56 : f32 to vector<2x1xf32>
      %86 = arith.mulf %85, %77 : vector<2x1xf32>
      %87 = arith.addf %84, %86 : vector<2x1xf32>
      %cst_57 = arith.constant 1.000000e-07 : f32
      %88 = vector.broadcast %cst_57 : f32 to vector<2x1xf32>
      %89 = arith.addf %87, %88 : vector<2x1xf32>
      %90 = arith.divf %81, %89 : vector<2x1xf32>
      %cst_58 = arith.constant 1.000000e-07 : f32
      %91 = vector.broadcast %cst_58 : f32 to vector<2x1xf32>
      %92 = arith.addf %69, %91 : vector<2x1xf32>
      %cst_59 = arith.constant 0.699999988 : f32
      %93 = vector.broadcast %cst_59 : f32 to vector<2x1xf32>
      %94 = arith.mulf %93, %78 : vector<2x1xf32>
      %95 = arith.addf %69, %94 : vector<2x1xf32>
      %cst_60 = arith.constant 3.000000e-01 : f32
      %96 = vector.broadcast %cst_60 : f32 to vector<2x1xf32>
      %97 = arith.mulf %96, %79 : vector<2x1xf32>
      %98 = arith.addf %95, %97 : vector<2x1xf32>
      %cst_61 = arith.constant 1.000000e-07 : f32
      %99 = vector.broadcast %cst_61 : f32 to vector<2x1xf32>
      %100 = arith.addf %98, %99 : vector<2x1xf32>
      %101 = arith.divf %92, %100 : vector<2x1xf32>
      %cst_62 = arith.constant 1.000000e+00 : f32
      %102 = vector.broadcast %cst_62 : f32 to vector<2x1xf32>
      %103 = arith.subf %102, %90 : vector<2x1xf32>
      %cst_63 = arith.constant 1.000000e+00 : f32
      %104 = vector.broadcast %cst_63 : f32 to vector<2x1xf32>
      %105 = arith.subf %104, %101 : vector<2x1xf32>
      %106 = math.log %103 : vector<2x1xf32>
      %cst_64 = arith.constant -7.500000e-01 : f32
      %107 = vector.broadcast %cst_64 : f32 to vector<2x1xf32>
      %108 = arith.mulf %107, %106 : vector<2x1xf32>
      %109 = math.exp %108 : vector<2x1xf32>
      %110 = arith.mulf %103, %109 : vector<2x1xf32>
      %111 = math.log %105 : vector<2x1xf32>
      %cst_65 = arith.constant -7.500000e-01 : f32
      %112 = vector.broadcast %cst_65 : f32 to vector<2x1xf32>
      %113 = arith.mulf %112, %111 : vector<2x1xf32>
      %114 = math.exp %113 : vector<2x1xf32>
      %115 = arith.mulf %105, %114 : vector<2x1xf32>
      %c0_66 = arith.constant 0 : index
      %c0_67 = arith.constant 0 : index
      %116 = vector.load %arg4[%c0_66, %c0_67] : memref<2x2xf32, #tpu.memory_space<vmem>>, vector<2x1xf32>
      tpu.vector_store %arg4[%c0_66, %c0_67], %110 {strides = array<i32>} : memref<2x2xf32, #tpu.memory_space<vmem>>, vector<2x1xf32>,
      %c0_68 = arith.constant 0 : index
      %c1 = arith.constant 1 : index
      %117 = vector.load %arg4[%c0_68, %c1] : memref<2x2xf32, #tpu.memory_space<vmem>>, vector<2x1xf32>
      tpu.vector_store %arg4[%c0_68, %c1], %115 {strides = array<i32>} : memref<2x2xf32, #tpu.memory_space<vmem>>, vector<2x1xf32>,
    } else {
    }
    return
  }
  func.func @transform_0(%arg0: i32, %arg1: i32) -> (i32, i32) {
    %c0_i32 = arith.constant 0 : i32
    return %arg0, %arg1 : i32, i32
  }
  func.func @transform_1(%arg0: i32, %arg1: i32) -> (i32, i32) {
    %c0_i32 = arith.constant 0 : i32
    return %arg0, %arg1 : i32, i32
  }
  func.func @transform_2(%arg0: i32, %arg1: i32) -> (i32, i32) {
    %c0_i32 = arith.constant 0 : i32
    %c0_i32_0 = arith.constant 0 : i32
    return %arg0, %c0_i32 : i32, i32
  }
}

</mosaic_0001>

<bundles_post_ra>
// kernel: tpu_custom_call.1
= control target key start
LH: loop header
LB: loop body
LE: loop exit
PB: predicated region body
PF: predicated region fallthrough
CT: control target
= control target key end

     0   :  { %7 = vsyncpa [#allocation9], 0  ;;  %s622_s0 = inlined_call_operand.hbm [shape: f32[2,512], index: 0, kind: input, shape index: {}]   ;;  %s623_s1 = inlined_call_operand.hbm [shape: f32[2,512], index: 1, kind: input, shape index: {}]   ;;  %s624_s2 = inlined_call_operand.hbm [shape: f32[2,2], index: 2, kind: output, shape index: {}]  }
   0x1   :  { %8 = vsyncpa [#allocation12], 0 }
   0x2   :  { %9 = vsyncpa [#allocation10], 0  ;;  %s512_s9 = smov [#allocation8]   ;;  %s513_s11 = smov [#allocation11]  }
   0x3   :  { %s16_s10 = sshll.u32 %s512_s9, 4  ;;  %s26_s12 = sshll.u32 %s513_s11, 4  ;;  %s17_s10 = int_to_ptr.vmem [resolvable:$true] %s16_s10  ;;  %s27_s12 = int_to_ptr.vmem [resolvable:$true] %s26_s12 }
   0x4   :  { %s440_s15 = scalar_lea.hbm %s622_s0, 128 }
   0x5   :  { %p441_p0 = scmp.ne.s32.totalorder %s622_s0, %s440_s15  ;;  %p444_p1 = scmp.lt.u32.totalorder %s440_s15, %s622_s0 }
   0x7   :  { %p446_p2 = pnand %p444_p1, %p441_p0 }
   0x9   :  { %449 = shalt.err (!%p446_p2)
}
   0xa   :  { %s450_s20 = scalar_lea.vmem %s17_s10, 128  ;;  %p455_p4 = scmp.lt.s32.totalorder %s17_s10, %s17_s10 }
   0xb   :  { %p451_p3 = scmp.ne.s32.totalorder %s17_s10, %s450_s20  ;;  %p456_p5 = scmp.lt.s32.totalorder %s450_s20, %s450_s20 }
   0xd   :  { %p457_p6 = por %p456_p5, %p455_p4 }
   0xf   :  { %p458_p7 = pnand %p457_p6, %p451_p3 }
  0x11   :  { %461 = shalt.err (!%p458_p7)
}
  0x12   :  { %19 = dma.hbm_to_vmem [thread:$0]  %s622_s0, 128, %s17_s10, [#allocation9]  }
  0x13   :  { %s462_s25 = scalar_lea.hbm %s623_s1, 128 }
  0x14   :  { %p463_p8 = scmp.ne.s32.totalorder %s623_s1, %s462_s25  ;;  %p466_p9 = scmp.lt.u32.totalorder %s462_s25, %s623_s1 }
  0x16   :  { %p468_p10 = pnand %p466_p9, %p463_p8 }
  0x18   :  { %471 = shalt.err (!%p468_p10)
}
  0x19   :  { %s472_s30 = scalar_lea.vmem %s27_s12, 128  ;;  %p477_p12 = scmp.lt.s32.totalorder %s27_s12, %s27_s12 }
  0x1a   :  { %p473_p11 = scmp.ne.s32.totalorder %s27_s12, %s472_s30  ;;  %p478_p13 = scmp.lt.s32.totalorder %s472_s30, %s472_s30 }
  0x1c   :  { %p479_p0 = por %p478_p13, %p477_p12 }
  0x1e   :  { %p480_p1 = pnand %p479_p0, %p473_p11 }
  0x20   :  { %483 = shalt.err (!%p480_p1)
}
  0x21   :  { %29 = dma.hbm_to_vmem [thread:$0]  %s623_s1, 128, %s27_s12, [#allocation12]  }
  0x22   :  { %506 = dma.done.wait [#allocation9], 128  }
  0x23   :  { %507 = vsyncadd [#allocation9], 4294967168 }
  0x24   :  { %508 = dma.done.wait [#allocation12], 128  }
  0x25   :  { %509 = vsyncadd [#allocation12], 4294967168  ;;  %v51_v0 = vlaneseq  ;;  %v514_v1 = vmov 1983009808   ;;  %vm40_vm0 = vcmask 1024   ;;  %v515_v5 = vmov 0.0  }
  0x26   :  { %v121_v2 = vunpack.c.l.s4 %v514_v1  ;;  %43 = vst.msk [vmem:[#allocation4] sm:$0x3] %vm40_vm0, %v515_v5  ;;  %41 = vst.msk [vmem:[#allocation2] sm:$0x3] %vm40_vm0, %v515_v5  ;;  %v50_v15 = vld [vmem:[#allocation11] sm:$0xff]  ;;  %vm140_vm2 = vcmask 1041408  }
  0x27   :  { %v124_v3 = vshrl.u32 %v51_v0, 7  ;;  %v52_v4 = vand.u32 127, %v51_v0  ;;  %42 = vst.msk [vmem:[#allocation3] sm:$0x3] %vm40_vm0, %v515_v5  ;;  %44 = vst.msk [vmem:[#allocation5] sm:$0x3] %vm40_vm0, %v515_v5  ;;  %v212_v18 = vcombine.high %v50_v15, %v50_v15 }
  0x28   :  { %45 = vst.msk [vmem:[#allocation6] sm:$0x3] %vm40_vm0, %v515_v5  ;;  %46 = vst.msk [vmem:[#allocation7] sm:$0x3] %vm40_vm0, %v515_v5  ;;  %v122_v6 = vunpack.c.0.s8 %v121_v2  ;;  %v47_v16 = vld [vmem:[#allocation8] sm:$0xff]  ;;  %s516_s1 = smov 1  }
  0x29   :  { %v53_v7 = vadd.s32 128, %v52_v4  ;;  %v54_v8 = vadd.s32 256, %v52_v4  ;;  %v55_v9 = vadd.s32 384, %v52_v4  ;;  %v60_v10 = vand.u32 1, %v52_v4  ;;  %s517_s4 = smov [#allocation13]  }
  0x2a   :  { %v563_v11 = vsub.s32 %v122_v6, %v124_v3  ;;  %v48_v20 = vmax.f32 %v47_v16, 1e-07  ;;  %s407_s5 = sshll.u32 %s517_s4, 4  ;;  %vm399_vm6 = vcmask 9224   ;;  %s408_s5 = int_to_ptr.vmem [resolvable:$true] %s407_s5 }
  0x2b   :  { %v67_v12 = vand.u32 1, %v53_v7  ;;  %v74_v13 = vand.u32 1, %v54_v8  ;;  %v81_v14 = vand.u32 1, %v55_v9  ;;  %vm104_vm1 = vcmp.eq.s32.totalorder %v60_v10, 0  ;;  %s484_s6 = scalar_lea.vmem %s408_s5, 32  ;;  %p489_p3 = scmp.lt.s32.totalorder %s408_s5, %s408_s5 }
  0x2c   :  { %v417_v17 = vsel %vm104_vm1, 1.0, %v515_v5  ;;  %v219_v19 = vrot.slane %v50_v15, %v563_v11  ;;  %v226_v22 = vrot.slane %v212_v18, %v563_v11  ;;  %v49_v25 = vmin.f32 %v48_v20, 0.9999999  ;;  %p485_p2 = scmp.ne.s32.totalorder %s408_s5, %s484_s6  ;;  %p490_p4 = scmp.lt.s32.totalorder %s484_s6, %s484_s6 }
  0x2d   :  { %vm105_vm3 = vcmp.eq.s32.totalorder %v67_v12, 0  ;;  %vm106_vm4 = vcmp.eq.s32.totalorder %v74_v13, 0  ;;  %vm107_vm5 = vcmp.eq.s32.totalorder %v81_v14, 0 }
  0x2e   :  { %v418_v21 = vsel %vm105_vm3, 1.0, %v515_v5  ;;  %v227_v23 = vcombine.high %v219_v19, %v219_v19  ;;  %v233_v24 = vsel %vm140_vm2, %v219_v19, 0.0  ;;  %v419_v26 = vsel %vm106_vm4, 1.0, %v515_v5  ;;  %p491_p5 = por %p490_p4, %p489_p3 }
  0x2f   :  { %v420_v27 = vsel %vm107_vm5, 1.0, %v515_v5  ;;  %v158_v28 = vcombine.low %v417_v17, %v418_v21  ;;  %v228_v29 = vcombine.high %v226_v22, %v226_v22  ;;  %v236_v31 = vsel %vm140_vm2, %v226_v22, 0.0 }
  0x30   :  { %v234_v30 = vsel %vm140_vm2, %v227_v23, 0.0  ;;  %v116_v32 = vmul.f32 %v50_v15, %v49_v25  ;;  %v159_v34 = vcombine.low %v419_v26, %v420_v27  ;;  %v281_v36 = vcombine.high %v49_v25, %v49_v25  ;;  %p492_p6 = pnand %p491_p5, %p485_p2 }
  0x31   :  { %v235_v33 = vadd.f32 %v234_v30, %v233_v24  ;;  %v166_v35 = vrot.slane %v158_v28, %v563_v11  ;;  %v238_v37 = vsel %vm140_vm2, %v228_v29, 0.0  ;;  %v288_v40 = vrot.slane %v49_v25, %v563_v11 }
  0x32   :  { %v119_v38 = vcombine.high %v116_v32, %v116_v32  ;;  %v126_v39 = vrot.slane %v116_v32, %v563_v11  ;;  %v173_v42 = vrot.slane %v159_v34, %v563_v11  ;;  %v295_v43 = vrot.slane %v281_v36, %v563_v11 }
  0x33   :  { %v237_v41 = vadd.f32 %v236_v31, %v235_v33  ;;  %v296_v47 = vcombine.high %v288_v40, %v288_v40  ;;  %v302_v50 = vsel %vm140_vm2, %v288_v40, 0.0  ;;  %v210_v40 = vld [vmem:[#allocation4] sm:$0x3] }
  0x34   :  { %v133_v44 = vrot.slane %v119_v38, %v563_v11  ;;  %v134_v45 = vcombine.high %v126_v39, %v126_v39  ;;  %v141_v46 = vsel %vm140_vm2, %v126_v39, 0.0  ;;  %v174_v49 = vcombine.low %v166_v35, %v173_v42 }
  0x35   :  { %v239_v48 = vadd.f32 %v238_v37, %v237_v41  ;;  %v303_v54 = vsel %vm140_vm2, %v296_v47, 0.0  ;;  %v297_v60 = vcombine.high %v295_v43, %v295_v43  ;;  %v305_v5 = vsel %vm140_vm2, %v295_v43, 0.0  ;;  %v117_v43 = vld [vmem:[#allocation2] sm:$0x3]  ;;  %v153_v47 = vld [vmem:[#allocation3] sm:$0x3] }
  0x36   :  { %v135_v51 = vcombine.high %v133_v44, %v133_v44  ;;  %v142_v52 = vsel %vm140_vm2, %v134_v45, 0.0  ;;  %v144_v53 = vsel %vm140_vm2, %v133_v44, 0.0  ;;  %v245_v56 = vmul.f32 %v174_v49, %v50_v15 }
  0x37   :  { %240 = vadd.xlane.f32.xlu1 %v239_v48  ;;  %v143_v55 = vadd.f32 %v142_v52, %v141_v46  ;;  %v176_v57 = vmul.f32 %v174_v49, %v116_v32  ;;  %v314_v58 = vmul.f32 %v174_v49, %v49_v25  ;;  %v304_v61 = vadd.f32 %v303_v54, %v302_v50  ;;  %v244_v46 = vld [vmem:[#allocation5] sm:$0x3]  ;;  %v313_v52 = vld [vmem:[#allocation7] sm:$0x3] }
  0x38   :  { %v146_v59 = vsel %vm140_vm2, %v135_v51, 0.0  ;;  %v247_v63 = vcombine.high %v245_v56, %v245_v56  ;;  %v254_v0 = vrot.slane %v245_v56, %v563_v11  ;;  %v307_v35 = vsel %vm140_vm2, %v297_v60, 0.0 }
  0x39   :  { %v145_v62 = vadd.f32 %v144_v53, %v143_v55  ;;  %v178_v1 = vcombine.high %v176_v57, %v176_v57  ;;  %v185_v2 = vrot.slane %v176_v57, %v563_v11  ;;  %v316_v3 = vcombine.high %v314_v58, %v314_v58  ;;  %v279_v53 = vld [vmem:[#allocation6] sm:$0x3] }
  0x3a   :  { %v323_v4 = vrot.slane %v314_v58, %v563_v11  ;;  %v261_v7 = vrot.slane %v247_v63, %v563_v11  ;;  %v262_v8 = vcombine.high %v254_v0, %v254_v0  ;;  %v268_v9 = vsel %vm140_vm2, %v254_v0, 0.0 }
  0x3b   :  { %v147_v6 = vadd.f32 %v146_v59, %v145_v62  ;;  %v192_v10 = vrot.slane %v178_v1, %v563_v11  ;;  %v193_v12 = vcombine.high %v185_v2, %v185_v2  ;;  %v199_v13 = vsel %vm140_vm2, %v185_v2, 0.0 }
  0x3c   :  { %v330_v14 = vrot.slane %v316_v3, %v563_v11  ;;  %v263_v15 = vcombine.high %v261_v7, %v261_v7  ;;  %v269_v16 = vsel %vm140_vm2, %v262_v8, 0.0  ;;  %v271_v17 = vsel %vm140_vm2, %v261_v7, 0.0 }
  0x3d   :  { %148 = vadd.xlane.f32.xlu0 %v147_v6  ;;  %v331_v18 = vcombine.high %v323_v4, %v323_v4  ;;  %v270_v19 = vadd.f32 %v269_v16, %v268_v9  ;;  %v194_v20 = vcombine.high %v192_v10, %v192_v10  ;;  %v200_v21 = vsel %vm140_vm2, %v193_v12, 0.0 }
  0x3e   :  { %v202_v22 = vsel %vm140_vm2, %v192_v10, 0.0  ;;  %v273_v23 = vsel %vm140_vm2, %v263_v15, 0.0  ;;  %v201_v24 = vadd.f32 %v200_v21, %v199_v13  ;;  %v332_v25 = vcombine.high %v330_v14, %v330_v14 }
  0x3f   :  { %v337_v26 = vsel %vm140_vm2, %v323_v4, 0.0  ;;  %v272_v11 = vadd.f32 %v271_v17, %v270_v19  ;;  %v204_v27 = vsel %vm140_vm2, %v194_v20, 0.0  ;;  %v338_v28 = vsel %vm140_vm2, %v331_v18, 0.0 }
  0x40   :  { %v340_v29 = vsel %vm140_vm2, %v330_v14, 0.0  ;;  %v203_v30 = vadd.f32 %v202_v22, %v201_v24  ;;  %v339_v31 = vadd.f32 %v338_v28, %v337_v26  ;;  %v306_v32 = vadd.f32 %v305_v5, %v304_v61 }
  0x41   :  { %v274_v33 = vadd.f32 %v273_v23, %v272_v11  ;;  %v342_v34 = vsel %vm140_vm2, %v332_v25, 0.0 }
  0x42   :  { %v205_v36 = vadd.f32 %v204_v27, %v203_v30  ;;  %v341_v37 = vadd.f32 %v340_v29, %v339_v31  ;;  %v308_v39 = vadd.f32 %v307_v35, %v306_v32 }
  0x43   :  { %275 = vadd.xlane.f32.xlu1 %v274_v33 }
  0x44   :  { %206 = vadd.xlane.f32.xlu0 %v205_v36  ;;  %v343_v38 = vadd.f32 %v342_v34, %v341_v37 }
  0x47   :  { %344 = vadd.xlane.f32.xlu1 %v343_v38 }
  0x48   :  { %309 = vadd.xlane.f32.xlu0 %v308_v39 }
  0xc4   :  { %v241_v41 = vpop.xlane.xlu1 %240 }
  0xc5   :  { %v242_v42 = vadd.f32 %v241_v41, %v210_v40 }
  0xc7   :  { %243 = vst.msk [vmem:[#allocation4] sm:$0x3] %vm40_vm0, %v242_v42 }
  0xca   :  { %v149_v44 = vpop.xlane.xlu0 %148 }
  0xcb   :  { %v150_v45 = vadd.f32 %v149_v44, %v117_v43 }
  0xcd   :  { %152 = vst.msk [vmem:[#allocation2] sm:$0x3] %vm40_vm0, %v150_v45 }
  0xce   :  { %v355_v59 = vld [vmem:[#allocation4] sm:$0x3] }
  0xd0   :  { %v276_v48 = vpop.xlane.xlu1 %275 }
  0xd1   :  { %v277_v49 = vadd.f32 %v276_v48, %v244_v46  ;;  %v207_v50 = vpop.xlane.xlu0 %206 }
  0xd2   :  { %v208_v51 = vadd.f32 %v207_v50, %v153_v47 }
  0xd3   :  { %278 = vst.msk [vmem:[#allocation5] sm:$0x3] %vm40_vm0, %v277_v49 }
  0xd4   :  { %209 = vst.msk [vmem:[#allocation3] sm:$0x3] %vm40_vm0, %v208_v51  ;;  %v345_v54 = vpop.xlane.xlu1 %344  ;;  %v352_v61 = vld [vmem:[#allocation2] sm:$0x3] }
  0xd5   :  { %v346_v55 = vadd.f32 %v345_v54, %v313_v52  ;;  %v310_v56 = vpop.xlane.xlu0 %309 }
  0xd6   :  { %v311_v57 = vadd.f32 %v310_v56, %v279_v53 }
  0xd7   :  { %347 = vst.msk [vmem:[#allocation7] sm:$0x3] %vm40_vm0, %v346_v55 }
  0xd8   :  { %312 = vst.msk [vmem:[#allocation6] sm:$0x3] %vm40_vm0, %v311_v57 }
  0xda   :  { %v354_v58 = vld [vmem:[#allocation5] sm:$0x3] }
  0xdb   :  { %v351_v60 = vld [vmem:[#allocation3] sm:$0x3]  ;;  %v356_v62 = vsub.f32 %v355_v59, %v354_v58 }
  0xdc   :  { %v353_v63 = vsub.f32 %v352_v61, %v351_v60  ;;  %v360_v0 = vsub.f32 %v354_v58, %v351_v60  ;;  %v364_v18 = vadd.f32 1e-07, %v351_v60 }
  0xde   :  { %v357_v1 = vld [vmem:[#allocation7] sm:$0x3]  ;;  %v362_v2 = vsub.f32 %v356_v62, %v353_v63  ;;  %v365_v3 = vmul.f32 0.7, %v360_v0  ;;  %v372_v21 = vadd.f32 1e-07, %v353_v63 }
  0xdf   :  { %v358_v4 = vld [vmem:[#allocation6] sm:$0x3]  ;;  %v361_v5 = vsub.f32 %v357_v1, %v351_v60 }
  0xe0   :  { %v359_v6 = vsub.f32 %v358_v4, %v357_v1  ;;  %v373_v7 = vmul.f32 0.7, %v362_v2  ;;  %v366_v9 = vadd.f32 %v365_v3, %v351_v60 }
  0xe1   :  { %v367_v8 = vmul.f32 0.3, %v361_v5 }
  0xe2   :  { %v363_v10 = vsub.f32 %v359_v6, %v353_v63  ;;  %v374_v13 = vadd.f32 %v373_v7, %v353_v63 }
  0xe3   :  { %v368_v12 = vadd.f32 %v367_v8, %v366_v9 }
  0xe4   :  { %v375_v14 = vmul.f32 0.3, %v363_v10 }
  0xe5   :  { %v369_v15 = vadd.f32 1e-07, %v368_v12 }
  0xe6   :  { %v376_v16 = vadd.f32 %v375_v14, %v374_v13 }
  0xe7   :  { %428 = vrcp.f32 %v369_v15 }
  0xe8   :  { %v377_v17 = vadd.f32 1e-07, %v376_v16 }
  0xea   :  { %430 = vrcp.f32 %v377_v17 }
  0xf1   :  { %v429_v19 = vpop.eup %428 }
  0xf2   :  { %v371_v20 = vmul.f32 %v429_v19, %v364_v18 }
  0xf4   :  { %v431_v22 = vpop.eup %430  ;;  %v380_v23 = vsub.f32 1.0, %v371_v20 }
  0xf5   :  { %v379_v24 = vmul.f32 %v431_v22, %v372_v21 }
  0xf6   :  { %432 = vlog2.f32 %v380_v23 }
  0xf7   :  { %v381_v25 = vsub.f32 1.0, %v379_v24 }
  0xf9   :  { %434 = vlog2.f32 %v381_v25 }
 0x100   :  { %v433_v26 = vpop.eup %432 }
 0x101   :  { %v383_v11 = vmul.f32 0.6931472, %v433_v26 }
 0x103   :  { %v435_v27 = vpop.eup %434  ;;  %v384_v28 = vmul.f32 -0.75, %v383_v11 }
 0x104   :  { %v389_v29 = vmul.f32 0.6931472, %v435_v27 }
 0x105   :  { %v385_v30 = vmul.f32 1.442695, %v384_v28 }
 0x106   :  { %v390_v31 = vmul.f32 -0.75, %v389_v29 }
 0x107   :  { %436 = vpow2.f32 %v385_v30 }
 0x108   :  { %v391_v32 = vmul.f32 1.442695, %v390_v31 }
 0x10a   :  { %438 = vpow2.f32 %v391_v32 }
 0x111   :  { %v437_v33 = vpop.eup %436 }
 0x112   :  { %v387_v34 = vmul.f32 %v437_v33, %v380_v23 }
 0x114   :  { %v439_v35 = vpop.eup %438  ;;  %394 = vst.msk [vmem:[#allocation13] sm:$0x3] %vm40_vm0, %v387_v34 }
 0x115   :  { %v393_v36 = vmul.f32 %v439_v35, %v381_v25 }
 0x117   :  { %396 = vrot.lane.b32.xlu0 %v393_v36, %s516_s1 }
 0x189   :  { %v397_v37 = vpop.permute.xlu0 %396 }
 0x18a   :  { %400 = vst.msk [vmem:[#allocation13] sm:$0x3] %vm399_vm6, %v397_v37 }
 0x18b   :  { %495 = shalt.err (!%p492_p6)
}
 0x18c   :  { %s496_s9 = scalar_lea.hbm %s624_s2, 32 }
 0x18d   :  { %p497_p7 = scmp.ne.s32.totalorder %s624_s2, %s496_s9  ;;  %p500_p8 = scmp.lt.u32.totalorder %s496_s9, %s624_s2 }
 0x18f   :  { %p502_p9 = pnand %p500_p8, %p497_p7 }
 0x191   :  { %505 = shalt.err (!%p502_p9)
}
 0x192   :  { %410 = dma.vmem_to_hbm [thread:$0]  %s408_s5, 32, %s624_s2, [#allocation10]  }
 0x193   :  { %510 = dma.done.wait [#allocation10], 32  }
 0x194   :  { %511 = vsyncadd [#allocation10], 4294967264 }
 0x195   :  { %414 = vsyncpa [#allocation9], 1 }
 0x196   :  { %415 = vsyncpa [#allocation12], 1 }
 0x197   :  { %416 = vsyncpa [#allocation10], 1 }

</bundles_post_ra>
